<compile_context>
chip_gen: v6e
topology: v6e:2x2x1
jax: 0.10.0
libtpu: 0.0.40
codegen_flags: <defaults>
</compile_context>

<pallas_src>
import functools

import jax
import jax.numpy as jnp
import numpy as np
from jax.experimental import pallas as pl
from jax.experimental.pallas import tpu as pltpu


# ----------------------------------------------------------------------------
# Tiling / hardware helpers (all trace-time Python)
# ----------------------------------------------------------------------------
def _cdiv(a, b):
    return -(-a // b)


def _round_up(a, b):
    return _cdiv(a, b) * b


def _row_align(dtype):
    # 8 rows for 32-bit, 16 for 16-bit, 32 for 8-bit (packed-sublane tiles).
    bits = jnp.dtype(dtype).itemsize * 8
    return max(8, 256 // bits)


def _vmem_limit_bytes():
    cap = 64 * 1024 * 1024  # conservative fallback (v7x physical per-TC VMEM)
    try:
        info = pltpu.get_tpu_info()
        cap = int(getattr(info, "vmem_capacity_bytes", cap))
    except Exception:
        pass
    # ~48 MiB on v7x (64 MiB physical), ~96 MiB on v5e/v6e (128 MiB physical).
    return int(min(cap * 3 // 4, 96 * 1024 * 1024))


def _num_tensorcores():
    try:
        info = pltpu.get_tpu_info()
        for attr in ("num_cores", "core_count", "num_tensorcores",
                     "tensorcore_count", "cores_per_chip"):
            v = getattr(info, attr, None)
            if isinstance(v, int) and v >= 1:
                return v
    except Exception:
        pass
    try:
        if "v7" in jax.devices()[0].device_kind.lower():
            return 2
    except Exception:
        pass
    return 1  # conservative: single-TC behavior


@functools.lru_cache(maxsize=None)
def _core_parallel_supported():
    """Probe-compile a trivial CORE_PARALLEL kernel so the v7x-only feature can
    never break single-TC chips (falls back to PARALLEL semantics)."""
    if _num_tensorcores() <= 1:
        return False

    def _copy(x_ref, o_ref):
        o_ref[...] = x_ref[...]

    try:
        fn = pl.pallas_call(
            _copy,
            out_shape=jax.ShapeDtypeStruct((16, 256), jnp.float32),
            grid_spec=pltpu.PrefetchScalarGridSpec(
                num_scalar_prefetch=0,
                grid=(2, 2),
                in_specs=[pl.BlockSpec((8, 128), lambda ci, ri: (ri, ci))],
                out_specs=pl.BlockSpec((8, 128), lambda ci, ri: (ri, ci))),
            compiler_params=pltpu.CompilerParams(
                dimension_semantics=(pltpu.CORE_PARALLEL, pltpu.ARBITRARY)))
        jax.block_until_ready(fn(jnp.zeros((16, 256), jnp.float32)))
        return True
    except Exception:
        return False


def _choose_c_tile(c, num_cores=1):
    """Lane-dense channel tile.  On multi-TC chips split C across cores so the
    channel grid axis has a real >1 extent; on single-TC chips keep C as one
    contiguous block unless it is very large."""
    if num_cores > 1 and c % (num_cores * 128) == 0:
        tc = c // num_cores
        while tc > 2048 and tc % 2 == 0 and (tc // 2) % 128 == 0:
            tc //= 2
        return tc
    if c <= 2048 or c % 128 != 0:
        return c
    for tc in (2048, 1024, 512, 256, 128):
        if c % tc == 0:
            return tc
    return c


def _channel_plan(c):
    """Returns (tc, use_core_parallel)."""
    nc = _num_tensorcores()
    use_mc = nc > 1 and _core_parallel_supported()
    tc = _choose_c_tile(c, nc if use_mc else 1)
    if use_mc and (c // tc) % nc != 0:
        use_mc = False
        tc = _choose_c_tile(c, 1)
    return tc, use_mc


def _semantics(use_mc, reduction):
    if use_mc:
        # Channels sharded across TensorCores; reduction (row) axis MUST stay
        # last + ARBITRARY so the shared accumulator pattern stays valid.
        return (pltpu.CORE_PARALLEL, pltpu.ARBITRARY)
    if reduction:
        return (pltpu.PARALLEL, pltpu.ARBITRARY)
    return (pltpu.PARALLEL, pltpu.PARALLEL)


def _choose_row_tile(n_rows, bytes_per_row, vmem_limit, row_align, cap=2048):
    """Largest row tile fitting the VMEM budget (bytes_per_row already includes
    the 2x pipeline buffers, so no further halving)."""
    slack = 2 * 1024 * 1024  # scratch + (1, tc) scale/bias/var buffers
    budget = max(vmem_limit - slack, row_align * max(bytes_per_row, 1))
    tm = (budget // max(bytes_per_row, 1)) // row_align * row_align
    tm = max(row_align, min(tm, cap))
    # Keep >= ~8 pipeline steps so prologue/epilogue stays a small fraction.
    target = _round_up(max(_cdiv(n_rows, 8), 1), row_align)
    tm = max(row_align, min(tm, target))
    assert tm % 8 == 0  # required by the (tm//8, 8, tc) sublane-group reshape
    return tm


# ----------------------------------------------------------------------------
# Kernel 1: mean(x^2) over the flattened (B*T) axis  ->  (1, C) float32
#   grid = (C_blocks [parallel/core_parallel], row_blocks [arbitrary, last])
# ----------------------------------------------------------------------------
def _meansq_kernel(x_ref, out_ref, acc_ref, *, inv_n, n_rows, ragged):
    ri = pl.program_id(1)

    @pl.when(ri == 0)
    def _init():
        acc_ref[...] = jnp.zeros_like(acc_ref)

    xs = x_ref[...].astype(jnp.float32)
    tm, tc = xs.shape
    sq = xs * xs
    if ragged:  # static: only emitted when B*T is not tile-divisible
        rows = ri * tm + jax.lax.broadcasted_iota(jnp.int32, (tm, 1), 0)
        sq = jnp.where(rows < n_rows, sq, 0.0)
    # Per-sublane-group partial sums: pure VPU adds in the hot loop.
    acc_ref[...] += jnp.sum(sq.reshape(tm // 8, 8, tc), axis=0)

    @pl.when(ri == pl.num_programs(1) - 1)
    def _finalize():
        # Single 8 -> 1 cross-sublane (XLU) reduce, paid once per C block.
        out_ref[...] = jnp.sum(acc_ref[...], axis=0, keepdims=True) * jnp.float32(inv_n)


def mean_square_over_bt(x2d, tc, use_mc):
    n, c = x2d.shape
    x_bytes = jnp.dtype(x2d.dtype).itemsize
    row_align = _row_align(x2d.dtype)
    vmem_limit = _vmem_limit_bytes()
    bytes_per_row = 2 * tc * x_bytes  # double-buffered x tile
    tm = _choose_row_tile(n, bytes_per_row, vmem_limit, row_align)
    rg = _cdiv(n, tm)
    ragged = (n % tm) != 0

    return pl.pallas_call(
        functools.partial(_meansq_kernel, inv_n=1.0 / n, n_rows=n, ragged=ragged),
        out_shape=jax.ShapeDtypeStruct((1, c), jnp.float32),
        grid_spec=pltpu.PrefetchScalarGridSpec(
            num_scalar_prefetch=0,
            grid=(c // tc, rg),
            in_specs=[pl.BlockSpec((tm, tc), lambda ci, ri: (ri, ci))],
            out_specs=pl.BlockSpec((1, tc), lambda ci, ri: (0, ci)),
            scratch_shapes=[pltpu.VMEM((8, tc), jnp.float32)],
        ),
        compiler_params=pltpu.CompilerParams(
            dimension_semantics=_semantics(use_mc, reduction=True),
            vmem_limit_bytes=vmem_limit),
        cost_estimate=pl.CostEstimate(
            flops=int(2 * n * c),
            transcendentals=0,
            bytes_accessed=int(n * c * x_bytes + c * 4)),
    )(x2d)


# ----------------------------------------------------------------------------
# Kernel 2: y = x * scale + bias   (scale = weight * rsqrt(denom+eps), hoisted)
# ----------------------------------------------------------------------------
def _apply_kernel(x_ref, scale_ref, bias_ref, o_ref):
    xs = x_ref[...].astype(jnp.float32)
    o_ref[...] = (xs * scale_ref[...] + bias_ref[...]).astype(o_ref.dtype)


def power_norm_apply(x2d, scale, bias_vec, tc, use_mc):
    n, c = x2d.shape
    x_bytes = jnp.dtype(x2d.dtype).itemsize
    y_bytes = x_bytes
    row_align = _row_align(x2d.dtype)
    vmem_limit = _vmem_limit_bytes()
    bytes_per_row = 2 * tc * (x_bytes + y_bytes)  # double-buffered x + y tiles
    tm = _choose_row_tile(n, bytes_per_row, vmem_limit, row_align)
    rg = _cdiv(n, tm)

    # TODO(synk): input_output_aliases={0: 0} (write y over x) when the caller
    # can donate x; skipped to keep x usable by the autograd-style caller.
    return pl.pallas_call(
        _apply_kernel,
        out_shape=jax.ShapeDtypeStruct((n, c), x2d.dtype),
        grid_spec=pltpu.PrefetchScalarGridSpec(
            num_scalar_prefetch=0,
            grid=(c // tc, rg),
            in_specs=[
                pl.BlockSpec((tm, tc), lambda ci, ri: (ri, ci)),
                pl.BlockSpec((1, tc), lambda ci, ri: (0, ci)),
                pl.BlockSpec((1, tc), lambda ci, ri: (0, ci)),
            ],
            out_specs=pl.BlockSpec((tm, tc), lambda ci, ri: (ri, ci)),
        ),
        compiler_params=pltpu.CompilerParams(
            dimension_semantics=_semantics(use_mc, reduction=False),
            vmem_limit_bytes=vmem_limit),
        cost_estimate=pl.CostEstimate(
            flops=int(2 * n * c),
            transcendentals=0,
            bytes_accessed=int(n * c * (x_bytes + y_bytes) + 2 * c * 4)),
    )(x2d, scale, bias_vec)


# ----------------------------------------------------------------------------
# Kernel 3 (post-warmup training): y = x*scale + bias  AND  mean(x^2) -> (1,C)
# x is streamed from HBM exactly once.
# ----------------------------------------------------------------------------
def _fused_kernel(x_ref, scale_ref, bias_ref, y_ref, var_ref, acc_ref,
                  *, inv_n, n_rows, ragged):
    ri = pl.program_id(1)

    @pl.when(ri == 0)
    def _init():
        acc_ref[...] = jnp.zeros_like(acc_ref)

    xs = x_ref[...].astype(jnp.float32)
    tm, tc = xs.shape
    sq = xs * xs
    if ragged:
        rows = ri * tm + jax.lax.broadcasted_iota(jnp.int32, (tm, 1), 0)
        sq = jnp.where(rows < n_rows, sq, 0.0)
    acc_ref[...] += jnp.sum(sq.reshape(tm // 8, 8, tc), axis=0)
    # Out-of-bounds y rows (ragged last tile) are dropped by Pallas writeback.
    y_ref[...] = (xs * scale_ref[...] + bias_ref[...]).astype(y_ref.dtype)

    @pl.when(ri == pl.num_programs(1) - 1)
    def _finalize():
        var_ref[...] = jnp.sum(acc_ref[...], axis=0, keepdims=True) * jnp.float32(inv_n)


def power_norm_apply_fused(x2d, scale, bias_vec, tc, use_mc):
    n, c = x2d.shape
    x_bytes = jnp.dtype(x2d.dtype).itemsize
    y_bytes = x_bytes
    row_align = _row_align(x2d.dtype)
    vmem_limit = _vmem_limit_bytes()
    bytes_per_row = 2 * tc * (x_bytes + y_bytes)
    tm = _choose_row_tile(n, bytes_per_row, vmem_limit, row_align)
    rg = _cdiv(n, tm)
    ragged = (n % tm) != 0

    y, var = pl.pallas_call(
        functools.partial(_fused_kernel, inv_n=1.0 / n, n_rows=n, ragged=ragged),
        out_shape=(jax.ShapeDtypeStruct((n, c), x2d.dtype),
                   jax.ShapeDtypeStruct((1, c), jnp.float32)),
        grid_spec=pltpu.PrefetchScalarGridSpec(
            num_scalar_prefetch=0,
            grid=(c // tc, rg),
            in_specs=[
                pl.BlockSpec((tm, tc), lambda ci, ri: (ri, ci)),
                pl.BlockSpec((1, tc), lambda ci, ri: (0, ci)),
                pl.BlockSpec((1, tc), lambda ci, ri: (0, ci)),
            ],
            out_specs=[
                pl.BlockSpec((tm, tc), lambda ci, ri: (ri, ci)),
                pl.BlockSpec((1, tc), lambda ci, ri: (0, ci)),
            ],
            scratch_shapes=[pltpu.VMEM((8, tc), jnp.float32)],
        ),
        compiler_params=pltpu.CompilerParams(
            dimension_semantics=_semantics(use_mc, reduction=True),
            vmem_limit_bytes=vmem_limit),
        cost_estimate=pl.CostEstimate(
            flops=int(4 * n * c),
            transcendentals=0,
            bytes_accessed=int(n * c * (x_bytes + y_bytes) + 3 * c * 4)),
    )(x2d, scale, bias_vec)
    return y, var


# ----------------------------------------------------------------------------
# SyncPowerNorm forward (module semantics)
# ----------------------------------------------------------------------------
def _get_alpha(current_iter, alpha_init, alpha_final, warmup_iters, total_iters):
    if current_iter <= warmup_iters:
        return alpha_init
    span = max(total_iters - warmup_iters, 1)
    progress = min((current_iter - warmup_iters) / span, 1.0)
    return alpha_init + (alpha_final - alpha_init) * progress


@functools.partial(
    jax.jit,
    static_argnames=("current_iter", "training", "eps", "alpha_init",
                     "alpha_final", "warmup_iters", "total_iters",
                     "tc", "use_mc"))
def _forward_jit(x, weight, bias, running_phi, *, current_iter, training,
                 eps, alpha_init, alpha_final, warmup_iters, total_iters,
                 tc, use_mc):
    b, t, c = x.shape
    n = b * t
    x2d = x.reshape(n, c)
    f32 = jnp.float32
    phi = running_phi.reshape(1, c).astype(f32)
    w = None if weight is None else weight.reshape(1, c).astype(f32)
    bb = None if bias is None else bias.reshape(1, c).astype(f32)

    def scale_bias(denom):
        inv = jax.lax.rsqrt(denom + f32(eps))            # (1, C) -- done ONCE
        if w is None:
            return inv, jnp.zeros((1, c), f32)
        return w * inv, bb

    if not training:
        scale, bvec = scale_bias(phi)
        y2d = power_norm_apply(x2d, scale, bvec, tc, use_mc)
        return y2d.reshape(b, t, c), running_phi

    if current_iter <= warmup_iters:
        # Warmup: the normalizer IS mean(x^2) -> reduce pass, then apply pass.
        # TODO(synk): when B*T*C fits in ~half the VMEM budget, a single
        # VMEM-resident kernel would save one full HBM read of x here.
        var = mean_square_over_bt(x2d, tc, use_mc)       # (1, C) f32
        scale, bvec = scale_bias(var)
        y2d = power_norm_apply(x2d, scale, bvec, tc, use_mc)
    else:
        # Post-warmup: normalizer is running_phi; mean(x^2) only feeds the
        # EMA, so its accumulation is fused into the normalize pass.
        scale, bvec = scale_bias(phi)
        y2d, var = power_norm_apply_fused(x2d, scale, bvec, tc, use_mc)

    # running_phi buffer updates (cheap (1, C) glue, fused by XLA).
    # NOTE: matches the torch code, which applies BOTH the warmup
    # running-average update and the unconditional EMA when
    # current_iter < warmup_iters (the torch source has no `else`).
    alpha = _get_alpha(current_iter, alpha_init, alpha_final,
                       warmup_iters, total_iters)
    phi_new = phi
    if 0 < current_iter < warmup_iters:
        phi_new = phi_new * ((current_iter - 1) / current_iter) + var / current_iter
    phi_new = alpha * phi_new + (1.0 - alpha) * var
    # TODO(synk): torch.distributed.all_reduce(AVG) of running_phi over
    # process_group is omitted; single-device semantics only.

    return y2d.reshape(b, t, c), phi_new.reshape(1, 1, c)


def sync_power_norm_forward(
    x, weight, bias, running_phi, current_iter, *,
    eps=1e-3, alpha_init=0.9, alpha_final=0.99999,
    warmup_iters=715, total_iters=19073, training=True,
):
    """Forward of SyncPowerNorm.

    x:            (B, T, C)
    weight, bias: (C,) or None (affine=False)
    running_phi:  (1, 1, C)
    current_iter: python int (mirrors `current_iter = iters.item()`)

    Returns (y, new_running_phi).
    """
    tc, use_mc = _channel_plan(x.shape[-1])  # eager (may probe-compile once)
    return _forward_jit(
        x, weight, bias, running_phi,
        current_iter=int(current_iter), training=bool(training),
        eps=float(eps), alpha_init=float(alpha_init),
        alpha_final=float(alpha_final), warmup_iters=int(warmup_iters),
        total_iters=int(total_iters), tc=tc, use_mc=use_mc)


# ----------------------------------------------------------------------------
# Pure-JAX reference for verification
# ----------------------------------------------------------------------------
def _reference_forward(x, weight, bias, running_phi, current_iter, *,
                       eps, alpha_init, alpha_final, warmup_iters, total_iters,
                       training):
    b, t, c = x.shape
    if not training:
        y = x * jax.lax.rsqrt(running_phi + eps)
        if weight is not None:
            y = weight.reshape(1, 1, c) * y + bias.reshape(1, 1, c)
        return y, running_phi

    var = jnp.mean(jnp.square(x), axis=(0, 1)).reshape(1, 1, c)
    if current_iter <= warmup_iters:
        y = x * jax.lax.rsqrt(var + eps)
    else:
        y = x * jax.lax.rsqrt(running_phi + eps)
    alpha = _get_alpha(current_iter, alpha_init, alpha_final,
                       warmup_iters, total_iters)
    phi = running_phi
    if current_iter < warmup_iters:
        phi = phi * (current_iter - 1) / current_iter + var / current_iter
    phi = alpha * phi + (1.0 - alpha) * var
    if weight is not None:
        y = weight.reshape(1, 1, c) * y + bias.reshape(1, 1, c)
    return y, phi


if __name__ == "__main__":
    eps = 1e-3
    alpha_init, alpha_final = 0.9, 0.99999
    warmup_iters, total_iters = 715, 19073

    key = jax.random.PRNGKey(0)
    # Second shape has B*T = 18, not a multiple of the 8-row tile, to exercise
    # the ragged in-kernel masking path (no pad / slice copies).
    test_shapes = [(2, 8, 128), (2, 9, 128)]

    for (B, T, C) in test_shapes:
        kx, kw, kb, kp, key = jax.random.split(key, 5)
        x = jax.random.normal(kx, (B, T, C), dtype=jnp.float32)
        weight = 1.0 + 0.1 * jax.random.normal(kw, (C,), dtype=jnp.float32)
        bias = 0.1 * jax.random.normal(kb, (C,), dtype=jnp.float32)
        running_phi = 1.0 + 0.2 * jax.random.uniform(kp, (1, 1, C),
                                                     dtype=jnp.float32)

        cases = [
            dict(current_iter=1, training=True, affine=True),     # warmup
            dict(current_iter=5000, training=True, affine=True),  # fused path
            dict(current_iter=5000, training=False, affine=True), # eval path
            dict(current_iter=5000, training=True, affine=False), # no affine
        ]
        for case in cases:
            w = weight if case["affine"] else None
            bvec = bias if case["affine"] else None
            y, phi_new = sync_power_norm_forward(
                x, w, bvec, running_phi, case["current_iter"],
                eps=eps, alpha_init=alpha_init, alpha_final=alpha_final,
                warmup_iters=warmup_iters, total_iters=total_iters,
                training=case["training"])
            y = jax.block_until_ready(y)
            phi_new = jax.block_until_ready(phi_new)

            y_ref, phi_ref = _reference_forward(
                x, w, bvec, running_phi, case["current_iter"],
                eps=eps, alpha_init=alpha_init, alpha_final=alpha_final,
                warmup_iters=warmup_iters, total_iters=total_iters,
                training=case["training"])

            np.testing.assert_allclose(np.asarray(y), np.asarray(y_ref),
                                       rtol=1e-5, atol=1e-5)
            np.testing.assert_allclose(np.asarray(phi_new).reshape(1, 1, C),
                                       np.asarray(phi_ref).reshape(1, 1, C),
                                       rtol=1e-5, atol=1e-5)

    print("KERNEL_OK")
</pallas_src>

<mosaic_0001>
module attributes {stable_mosaic.version = 11 : i64} {
  func.func @_apply_kernel(%arg0: i32, %arg1: i32, %arg2: memref<8x128xf32, #tpu.memory_space<vmem>>, %arg3: memref<1x128xf32, #tpu.memory_space<vmem>>, %arg4: memref<1x128xf32, #tpu.memory_space<vmem>>, %arg5: memref<8x128xf32, #tpu.memory_space<vmem>>) attributes {dimension_semantics = [#tpu.dimension_semantics<parallel>, #tpu.dimension_semantics<parallel>], iteration_bounds = array<i64: 1, 2>, scalar_prefetch = 0 : i64, scratch_operands = 0 : i64, tpu.core_type = #tpu.core_type<tc>, window_params = [{transform_indices = @transform_0, window_bounds = array<i64: 8, 128>}, {transform_indices = @transform_1, window_bounds = array<i64: 1, 128>}, {transform_indices = @transform_2, window_bounds = array<i64: 1, 128>}, {transform_indices = @transform_3, window_bounds = array<i64: 8, 128>}]} {
    %c0 = arith.constant 0 : index
    %c0_0 = arith.constant 0 : index
    %0 = vector.load %arg2[%c0, %c0_0] : memref<8x128xf32, #tpu.memory_space<vmem>>, vector<8x128xf32>
    %c0_1 = arith.constant 0 : index
    %c0_2 = arith.constant 0 : index
    %1 = vector.load %arg3[%c0_1, %c0_2] : memref<1x128xf32, #tpu.memory_space<vmem>>, vector<1x128xf32>
    %2 = vector.broadcast %1 : vector<1x128xf32> to vector<8x128xf32>
    %3 = arith.mulf %0, %2 : vector<8x128xf32>
    %c0_3 = arith.constant 0 : index
    %c0_4 = arith.constant 0 : index
    %4 = vector.load %arg4[%c0_3, %c0_4] : memref<1x128xf32, #tpu.memory_space<vmem>>, vector<1x128xf32>
    %5 = vector.broadcast %4 : vector<1x128xf32> to vector<8x128xf32>
    %6 = arith.addf %3, %5 : vector<8x128xf32>
    %c0_5 = arith.constant 0 : index
    %c0_6 = arith.constant 0 : index
    %7 = vector.load %arg5[%c0_5, %c0_6] : memref<8x128xf32, #tpu.memory_space<vmem>>, vector<8x128xf32>
    tpu.vector_store %arg5[%c0_5, %c0_6], %6 {strides = array<i32>} : memref<8x128xf32, #tpu.memory_space<vmem>>, vector<8x128xf32>,
    return
  }
  func.func @transform_0(%arg0: i32, %arg1: i32) -> (i32, i32) {
    %c0_i32 = arith.constant 0 : i32
    return %arg1, %arg0 : i32, i32
  }
  func.func @transform_1(%arg0: i32, %arg1: i32) -> (i32, i32) {
    %c0_i32 = arith.constant 0 : i32
    %c0_i32_0 = arith.constant 0 : i32
    return %c0_i32, %arg0 : i32, i32
  }
  func.func @transform_2(%arg0: i32, %arg1: i32) -> (i32, i32) {
    %c0_i32 = arith.constant 0 : i32
    %c0_i32_0 = arith.constant 0 : i32
    return %c0_i32, %arg0 : i32, i32
  }
  func.func @transform_3(%arg0: i32, %arg1: i32) -> (i32, i32) {
    %c0_i32 = arith.constant 0 : i32
    return %arg1, %arg0 : i32, i32
  }
}

module attributes {stable_mosaic.version = 11 : i64} {
  func.func @_meansq_kernel(%arg0: i32, %arg1: i32, %arg2: memref<8x128xf32, #tpu.memory_space<vmem>>, %arg3: memref<1x128xf32, #tpu.memory_space<vmem>>, %arg4: memref<8x128xf32, #tpu.memory_space<vmem>>) attributes {dimension_semantics = [#tpu.dimension_semantics<parallel>, #tpu.dimension_semantics<arbitrary>], iteration_bounds = array<i64: 1, 2>, scalar_prefetch = 0 : i64, scratch_operands = 1 : i64, tpu.core_type = #tpu.core_type<tc>, window_params = [{transform_indices = @transform_0, window_bounds = array<i64: 8, 128>}, {transform_indices = @transform_1, window_bounds = array<i64: 1, 128>}]} {
    %c0_i32 = arith.constant 0 : i32
    %0 = arith.cmpi eq, %arg1, %c0_i32 : i32
    %1 = arith.extui %0 : i1 to i32
    %c0_i32_0 = arith.constant 0 : i32
    %2 = arith.cmpi ne, %1, %c0_i32_0 : i32
    scf.if %2 {
      %cst_7 = arith.constant 0.000000e+00 : f32
      %13 = vector.broadcast %cst_7 : f32 to vector<8x128xf32>
      %c0_8 = arith.constant 0 : index
      %c0_9 = arith.constant 0 : index
      %14 = vector.load %arg4[%c0_8, %c0_9] : memref<8x128xf32, #tpu.memory_space<vmem>>, vector<8x128xf32>
      tpu.vector_store %arg4[%c0_8, %c0_9], %13 {strides = array<i32>} : memref<8x128xf32, #tpu.memory_space<vmem>>, vector<8x128xf32>,
    } else {
    }
    %c0 = arith.constant 0 : index
    %c0_1 = arith.constant 0 : index
    %3 = vector.load %arg2[%c0, %c0_1] : memref<8x128xf32, #tpu.memory_space<vmem>>, vector<8x128xf32>
    %4 = arith.mulf %3, %3 : vector<8x128xf32>
    %c0_2 = arith.constant 0 : index
    %c0_3 = arith.constant 0 : index
    %5 = vector.load %arg4[%c0_2, %c0_3] : memref<8x128xf32, #tpu.memory_space<vmem>>, vector<8x128xf32>
    %6 = vector.shape_cast %4 : vector<8x128xf32> to vector<1x8x128xf32>
    %cst = arith.constant dense<0.000000e+00> : vector<8x128xf32>
    %7 = vector.multi_reduction <add>, %6, %cst [0] : vector<1x8x128xf32> to vector<8x128xf32>
    %8 = arith.addf %5, %7 : vector<8x128xf32>
    %c0_4 = arith.constant 0 : index
    %c0_5 = arith.constant 0 : index
    %9 = vector.load %arg4[%c0_4, %c0_5] : memref<8x128xf32, #tpu.memory_space<vmem>>, vector<8x128xf32>
    tpu.vector_store %arg4[%c0_4, %c0_5], %8 {strides = array<i32>} : memref<8x128xf32, #tpu.memory_space<vmem>>, vector<8x128xf32>,
    %c1_i32 = arith.constant 1 : i32
    %10 = arith.cmpi eq, %arg1, %c1_i32 : i32
    %11 = arith.extui %10 : i1 to i32
    %c0_i32_6 = arith.constant 0 : i32
    %12 = arith.cmpi ne, %11, %c0_i32_6 : i32
    scf.if %12 {
      %c0_7 = arith.constant 0 : index
      %c0_8 = arith.constant 0 : index
      %13 = vector.load %arg4[%c0_7, %c0_8] : memref<8x128xf32, #tpu.memory_space<vmem>>, vector<8x128xf32>
      %cst_9 = arith.constant dense<0.000000e+00> : vector<128xf32>
      %14 = vector.multi_reduction <add>, %13, %cst_9 [0] : vector<8x128xf32> to vector<128xf32>
      %15 = vector.shape_cast %14 : vector<128xf32> to vector<1x128xf32>
      %cst_10 = arith.constant 6.250000e-02 : f32
      %16 = vector.broadcast %cst_10 : f32 to vector<1x128xf32>
      %17 = arith.mulf %15, %16 : vector<1x128xf32>
      %c0_11 = arith.constant 0 : index
      %c0_12 = arith.constant 0 : index
      %18 = vector.load %arg3[%c0_11, %c0_12] : memref<1x128xf32, #tpu.memory_space<vmem>>, vector<1x128xf32>
      tpu.vector_store %arg3[%c0_11, %c0_12], %17 {strides = array<i32>} : memref<1x128xf32, #tpu.memory_space<vmem>>, vector<1x128xf32>,
    } else {
    }
    return
  }
  func.func @transform_0(%arg0: i32, %arg1: i32) -> (i32, i32) {
    %c0_i32 = arith.constant 0 : i32
    return %arg1, %arg0 : i32, i32
  }
  func.func @transform_1(%arg0: i32, %arg1: i32) -> (i32, i32) {
    %c0_i32 = arith.constant 0 : i32
    %c0_i32_0 = arith.constant 0 : i32
    return %c0_i32, %arg0 : i32, i32
  }
}

</mosaic_0001>

<bundles_post_ra>
// kernel: _forward_jit.2
= control target key start
LH: loop header
LB: loop body
LE: loop exit
PB: predicated region body
PF: predicated region fallthrough
CT: control target
= control target key end

     0   :  { %6 = vsyncpa [#allocation4], 0  ;;  %s494_s0 = inlined_call_operand.hbm [shape: f32[16,128], index: 0, kind: input, shape index: {}]   ;;  %s495_s1 = inlined_call_operand.vmem [shape: f32[1,128], index: 1, kind: output, shape index: {}]  }
   0x1   :  { %8 = vsyncpa [#allocation4 + $0x1], 0  ;;  %s394_s6 = smov 0   ;;  %s396_s7 = smov 0  }
   0x2   :  { %s398_s8 = smov 0   ;;  %s400_s9 = smov 0  }
   0x3   :  { %s402_s10 = smov 0   ;;  %s404_s11 = smov 0  }
   0x4 LB: > { %s234_s12 = sadd.s32 4294967295, %s380_s11   ;;  %s23_s13 = sadd.s32 1, %s376_s10  ;;  %s380_s11 = sphi %s404_s11, %s14_s11   ;;  %s376_s10 = sphi %s402_s10, %s503_s10   ;;  %s372_s9 = sphi %s400_s9, %s502_s9   ;;  %s368_s8 = sphi %s398_s8, %s501_s8   ;;  %s364_s7 = sphi %s396_s7, %s500_s7   ;;  %s360_s6 = sphi %s394_s6, %s499_s6  }
   0x5   : > { %p24_p0 = scmp.ge.s32.totalorder %s23_s13, 2  ;;  %s35_s14 = sadd.s32 1, %s368_s8 }
   0x6   : > { %p42_p1 = scmp.ne.s32.totalorder %s368_s8, %s364_s7  ;;  %p43_p2 = scmp.eq.s32.totalorder %s380_s11, 0 }
   0x7   : > { %s505_s13 = smov (%p24_p0, %s23_s13), 0  ;;  %p48_p4 = scmp.ne.s32.totalorder %s364_s7, %s360_s6 }
   0x8   : > { %p430_p3 = por %p43_p2, %p42_p1  ;;  %s30_s16 = ssub.s32 %s376_s10, %s505_s13 }
   0x9   : > { %p49_p5 = scmp.eq.s32.totalorder %s234_s12, 0  ;;  %p33_p6 = scmp.eq.s32.totalorder %s30_s16, 0 }
   0xa   : > { %p252_p8 = scmp.lt.s32.totalorder %s380_s11, 2  ;;  %s98_s19 = sand.u32 1, %s368_s8  }
   0xb   : > { %p437_p7 = por %p49_p5, %p48_p4  ;;  %s238_s20 = sshll.u32 %s376_s10, 7 }
   0xc   : > { %s443_s18 = scalar_select %p33_p6, %s368_s8, %s35_s14  }
   0xd   : > { %s237_s21 = sshll.u32 %s98_s19, 3  ;;  %s108_s24 = scalar_lea.hbm %s494_s0, %s238_s20 }
   0xe   : > { %s102_s25 = scalar_lea.vmem [#allocation3], %s237_s21  ;;  %p452_p9 = pnand %p252_p8, %p430_p3 }
   0xf   : > { %s110_s26 = sshll.u32 %s102_s25, 4  ;;  %p239_p10 = scmp.ge.s32.totalorder %s380_s11, 1  ;;  %s111_s26 = int_to_ptr.vmem [resolvable:$true] %s110_s26 }
  0x10   : > { %p115_p11 = scmp.lt.s32.totalorder %s380_s11, 3  ;;  %s99_s28 = scalar_lea.sflag [#allocation4], %s98_s19 }
  0x11   : > { %p304_p12 = pneg %p452_p9  ;;  %s315_s29 = scalar_lea.vmem %s111_s26, 128 }
  0x12   : > { %p316_p13 = scmp.ne.s32.totalorder %s111_s26, %s315_s29  ;;  %s382_s30 = smov [#allocation3]  }
  0x13   : > { %s320_s2 = sshll.u32 %s382_s30, 4  ;;  %s321_s2 = int_to_ptr.vmem [resolvable:$false] %s320_s2 }
  0x14   : > { %p318_p0 = pnand %p316_p13, %p304_p12  ;;  %s322_s3 = scalar_lea.vmem %s321_s2, 256 }
  0x15   : > { %p323_p2 = scmp.lt.s32.totalorder %s111_s26, %s321_s2  ;;  %p324_p3 = scmp.lt.s32.totalorder %s322_s3, %s315_s29 }
  0x16   : > { %p319_p1 = pneg %p318_p0 }
  0x17   : > { %p325_p4 = por %p324_p3, %p323_p2 }
  0x19   : > { %p326_p5 = pnand %p325_p4, %p319_p1 }
  0x1b   : > { %329 = shalt.err (!%p326_p5)
}
  0x1c   : > { %251 = dma.hbm_to_vmem [thread:$0]  (!%p452_p9), %s108_s24, 128, %s111_s26, %s99_s28  }
  0x1d   : > { %p116_p6 = pnand %p239_p10, %p115_p11 }
  0x1e   : > { %s121_s4 = sand.u32 (!%p116_p6), 1, %s364_s7  }
  0x1f   : > { %119 = sbr.rel (%p116_p6) target bundleno = 78 (0x4e), region = 24  ;;  %s240_s5 = sshll.u32 (!%p116_p6), %s121_s4, 3 }
  0x20   : > { %s122_s6 = scalar_lea.sflag (!%p116_p6), [#allocation4], %s121_s4  ;;  %s125_s12 = scalar_lea.vmem (!%p116_p6), [#allocation3], %s240_s5 }
  0x24   : > { %355 = dma.done.wait (%p437_p7), %s122_s6, 128  }
  0x25   : > { %357 = vsyncadd (%p437_p7), %s122_s6, 4294967168  ;;  %p241_p8 = scmp.ne.s32.totalorder %s372_s9, 0 }
  0x27   : > { %148 = sbr.rel (%p241_p8) target bundleno = 46 (0x2e), region = 32 }
  0x2c   : > { %v383_v0 = vmov 0.0  }
  0x2d   : > { %149 = vst [vmem:[#allocation2] sm:$0xff] %v383_v0 }
  0x2e PF: > { %v150_v1 = vld [vmem:[%s125_s12] sm:$0xff]  ;;  %p242_p9 = scmp.ne.s32.totalorder %s372_s9, 1 }
  0x2f   : > { %v151_v3 = vmul.f32 %v150_v1, %v150_v1 }
  0x33   : > { %159 = sbr.rel (%p242_p9) target bundleno = 78 (0x4e), region = 36 }
  0x34   : > { %v152_v2 = vld [vmem:[#allocation2] sm:$0xff] }
  0x35   : > { %v154_v4 = vadd.f32 %v152_v2, %v151_v3 }
  0x37   : > { %155 = vst [vmem:[#allocation2] sm:$0xff] %v154_v4 }
  0x3e   : > { %v160_v5 = vld [vmem:[#allocation2] sm:$0xff] }
  0x3f   : > { %v161_v6 = vrot.slane %v160_v5, 4 }
  0x41   : > { %v162_v7 = vadd.f32 %v161_v6, %v160_v5 }
  0x43   : > { %v163_v8 = vrot.slane %v162_v7, 2 }
  0x45   : > { %v164_v9 = vadd.f32 %v163_v8, %v162_v7 }
  0x47   : > { %v165_v10 = vrot.slane %v164_v9, 1 }
  0x49   : > { %v166_v11 = vadd.f32 %v165_v10, %v164_v9 }
  0x4b   : > { %v167_v12 = vmul.f32 0.0625, %v166_v11 }
  0x4d   : > { %168 = vst [vmem:[%s495_s1] sm:$0x1] %v167_v12 }
  0x4e PF: > { %s14_s11 = sadd.s32 1, %s380_s11   ;;  %s499_s6 = smov %s364_s7 }
  0x4f   : > { %p11_p7 = scmp.ge.s32.totalorder %s14_s11, 4   ;;  %s500_s7 = smov %s368_s8 }
  0x50   : > { %s501_s8 = smov %s443_s18  ;;  %s502_s9 = smov %s376_s10 }
  0x51   : > { %s503_s10 = smov %s505_s13  ;;  %13 = sbr.rel (!%p11_p7) target bundleno = 4 (0x4), region = 72 }
  0x56   :  { %186 = vsyncpa [#allocation4], 1 }
  0x57   :  { %188 = vsyncpa [#allocation4 + $0x1], 1 }

// kernel: _forward_jit.3
= control target key start
LH: loop header
LB: loop body
LE: loop exit
PB: predicated region body
PF: predicated region fallthrough
CT: control target
= control target key end

     0   :  { %8 = vsyncpa [#allocation3], 0  ;;  %s621_s0 = inlined_call_operand.vmem [shape: f32[16,128], index: 0, kind: input, shape index: {}]   ;;  %s622_s1 = inlined_call_operand.vmem [shape: f32[1,128], index: 1, kind: input, shape index: {}]   ;;  %s623_s2 = inlined_call_operand.vmem [shape: f32[1,128], index: 2, kind: input, shape index: {}]   ;;  %s624_s3 = inlined_call_operand.hbm [shape: f32[16,128], index: 3, kind: output, shape index: {}]  }
   0x1   :  { %10 = vsyncpa [#allocation3 + $0x1], 0  ;;  %s516_s12 = smov 0   ;;  %s518_s13 = smov 0  }
   0x2   :  { %s520_s14 = smov 0   ;;  %s522_s15 = smov 0  }
   0x3   :  { %s524_s16 = smov 0   ;;  %s526_s17 = smov 0  }
   0x4 LB: > { %s347_s18 = sadd.s32 4294967295, %s493_s17   ;;  %s348_s19 = sadd.s32 4294967294, %s493_s17   ;;  %s493_s17 = sphi %s526_s17, %s16_s17   ;;  %s489_s16 = sphi %s524_s16, %s631_s16   ;;  %s485_s15 = sphi %s522_s15, %s630_s15   ;;  %s481_s14 = sphi %s520_s14, %s629_s14   ;;  %s477_s13 = sphi %s518_s13, %s628_s13   ;;  %s473_s12 = sphi %s516_s12, %s627_s12  }
   0x5   : > { %s25_s20 = sadd.s32 1, %s489_s16  ;;  %s117_s21 = sadd.s32 1, %s481_s14 }
   0x6   : > { %p26_p0 = scmp.ge.s32.totalorder %s25_s20, 2  ;;  %p127_p1 = scmp.ne.s32.totalorder %s481_s14, %s477_s13 }
   0x7   : > { %p128_p2 = scmp.eq.s32.totalorder %s347_s18, 1  ;;  %p133_p3 = scmp.ne.s32.totalorder %s477_s13, %s473_s12 }
   0x8   : > { %s633_s20 = smov (%p26_p0, %s25_s20), 0  ;;  %p134_p5 = scmp.eq.s32.totalorder %s348_s19, 1 }
   0x9   : > { %p556_p4 = por %p128_p2, %p127_p1  ;;  %s112_s23 = ssub.s32 %s489_s16, %s633_s20 }
   0xa   : > { %p353_p6 = scmp.ge.s32.totalorder %s493_s17, 1  ;;  %p115_p7 = scmp.eq.s32.totalorder %s112_s23, 0 }
   0xb   : > { %p563_p8 = por %p134_p5, %p133_p3  ;;  %p174_p9 = scmp.lt.s32.totalorder %s493_s17, 3 }
   0xc   : > { %s569_s25 = scalar_select %p115_p7, %s481_s14, %s117_s21  }
   0xd   : > { %p175_p10 = pnand %p353_p6, %p174_p9 }
   0xe   : > { %s203_s26 = sand.u32 (!%p175_p10), 1, %s477_s13   ;;  %p206_p11 = scmp.lt.s32.totalorder (!%p175_p10), %s485_s15, 1 }
   0xf   : > { %178 = sbr.rel (%p175_p10) target bundleno = 45 (0x2d), region = 32  ;;  %s354_s27 = sshll.u32 (!%p175_p10), %s203_s26, 3 }
  0x10   : > { %s205_s10 = scalar_lea.vmem (!%p175_p10), [#allocation2], %s354_s27  ;;  %s359_s18 = sshll.u32 (!%p175_p10), %s485_s15, 7 }
  0x11   : > { %s252_s11 = sshll.u32 (!%p175_p10), %s205_s10, 4  ;;  %s250_s23 = scalar_lea.hbm (!%p175_p10), %s624_s3, %s359_s18  ;;  %s253_s11 = int_to_ptr.vmem [resolvable:$true] %s252_s11 }
  0x12   : > { %s417_s30 = scalar_lea.vmem (!%p175_p10), %s253_s11, 128 }
  0x13   : > { %p418_p12 = scmp.ne.s32.totalorder (!%p175_p10), %s253_s11, %s417_s30 }
  0x14   : > { %s207_s28 = scalar_select %p206_p11, %s485_s15, 1  ;;  %v356_v0 = vld [vmem:[%s622_s1] ss:$0 sm:$0xff] }
  0x15   : > { %v357_v2 = vld [vmem:[%s623_s2] ss:$0 sm:$0xff]  ;;  %p419_p13 = pnand %p418_p12, %p556_p4 }
  0x16   : > { %s355_s29 = sshll.u32 %s207_s28, 3  ;;  %s238_s28 = scalar_lea.sflag [#allocation3], %s203_s26 }
  0x17   : > { %s212_s7 = scalar_lea.vmem %s621_s0, %s355_s29  ;;  %p420_p0 = pneg %p419_p13 }
  0x18   : > { %v219_v1 = vld [vmem:[%s212_s7] sm:$0xff]  ;;  %s495_s29 = smov [#allocation2]  }
  0x19   : > { %v227_v3 = vmul.f32 %v356_v0, %v219_v1  ;;  %s421_s4 = sshll.u32 %s495_s29, 4  ;;  %s422_s4 = int_to_ptr.vmem [resolvable:$false] %s421_s4 }
  0x1a   : > { %s423_s27 = scalar_lea.vmem %s422_s4, 256  ;;  %p424_p1 = scmp.lt.s32.totalorder %s253_s11, %s422_s4 }
  0x1b   : > { %v235_v4 = vadd.f32 %v357_v2, %v227_v3  ;;  %p425_p2 = scmp.lt.s32.totalorder %s423_s27, %s417_s30 }
  0x1d   : > { %236 = vst [vmem:[%s205_s10] sm:$0xff] %v235_v4  ;;  %p426_p3 = por %p425_p2, %p424_p1 }
  0x1f   : > { %p427_p5 = pnand %p426_p3, %p420_p0 }
  0x21   : > { %430 = shalt.err (!%p427_p5)
}
  0x22   : > { %s431_s15 = scalar_lea.hbm %s250_s23, 128  ;;  %s435_s6 = scalar_lea.hbm %s624_s3, 256 }
  0x23   : > { %p432_p6 = scmp.ne.s32.totalorder %s250_s23, %s431_s15  ;;  %p436_p10 = scmp.lt.s32.totalorder %s250_s23, %s624_s3 }
  0x24   : > { %p437_p11 = scmp.lt.s32.totalorder %s435_s6, %s431_s15 }
  0x25   : > { %p433_p7 = pnand %p432_p6, %p556_p4 }
  0x26   : > { %p438_p12 = por %p437_p11, %p436_p10 }
  0x27   : > { %p434_p9 = pneg %p433_p7 }
  0x29   : > { %p439_p13 = pnand %p438_p12, %p434_p9 }
  0x2b   : > { %442 = shalt.err (!%p439_p13)
}
  0x2c   : > { %362 = dma.vmem_to_hbm [thread:$0]  (%p556_p4), %s253_s11, 128, %s250_s23, %s238_s28  }
  0x2d PF: > { %p368_p0 = scmp.ge.s32.totalorder %s493_s17, 2  ;;  %s264_s9 = sand.u32 1, %s473_s12  }
  0x2e   : > { %s265_s10 = scalar_lea.sflag [#allocation3], %s264_s9 }
  0x2f   : > { %p365_p1 = pnand %p368_p0, %p563_p8 }
  0x31   : > { %p366_p2 = pneg %p365_p1 }
  0x33   : > { %468 = dma.done.wait (%p366_p2), %s265_s10, 128  }
  0x34   : > { %470 = vsyncadd (%p366_p2), %s265_s10, 4294967168  ;;  %s16_s17 = sadd.s32 1, %s493_s17   ;;  %s627_s12 = smov %s477_s13 }
  0x35   : > { %p13_p3 = scmp.ge.s32.totalorder %s16_s17, 4   ;;  %s628_s13 = smov %s481_s14 }
  0x36   : > { %s629_s14 = smov %s569_s25  ;;  %s630_s15 = smov %s489_s16 }
  0x37   : > { %s631_s16 = smov %s633_s20  ;;  %15 = sbr.rel (!%p13_p3) target bundleno = 4 (0x4), region = 73 }
  0x3c   :  { %270 = vsyncpa [#allocation3], 1 }
  0x3d   :  { %272 = vsyncpa [#allocation3 + $0x1], 1 }

</bundles_post_ra>
